<compile_context>
chip_gen: v6e
topology: v6e:2x2x1
jax: 0.10.0
libtpu: 0.0.40
codegen_flags: <defaults>
</compile_context>

<pallas_src>
import jax
import jax.numpy as jnp
from jax import lax
from jax.experimental import pallas as pl
from jax.experimental.pallas import tpu as pltpu

_LANES = 128
_CHUNK_ROWS = 256          # rows per in-kernel fori_loop step (multiple of 8/16/32)

_CORE_PARALLEL = getattr(pltpu, "CORE_PARALLEL", pltpu.PARALLEL)


def _round_down(a, b):
    return (a // b) * b


def _tpu_generation():
    """Best-effort TPU generation from the device kind string (None if unknown)."""
    try:
        kind = jax.devices()[0].device_kind.lower()
    except Exception:
        return None
    for gen in (7, 6, 5, 4):
        if f"v{gen}" in kind or f"tpu{gen}" in kind:
            return gen
    return None


def _block_budget_bytes(gen):
    """Per-input, per-pipeline-buffer VMEM budget for the streamed blocks."""
    if gen == 7:
        return 4 << 20     # 2 inputs x 2 bufs x 4 MiB = 16 MiB (default scoped 32 MiB)
    if gen == 6:
        return 4 << 20     # 16 MiB total                       (default scoped 32 MiB)
    return 2 << 20         # v5e & unknown: 8 MiB total         (default scoped 16 MiB)


def _iou_partial_kernel(x_ref, y_ref, inter_ref, total_ref):
    j = pl.program_id(1)

    @pl.when(j == 0)
    def _():
        # Output blocks are resident across the (arbitrary) j axis -> accumulators.
        inter_ref[...] = jnp.zeros_like(inter_ref)
        total_ref[...] = jnp.zeros_like(total_ref)

    block_rows = x_ref.shape[0]
    chunk = min(block_rows, _CHUNK_ROWS)   # static; divides block_rows by construction
    n_chunks = block_rows // chunk

    def reduce_into(x, y):
        # Load each x/y vreg once and feed both reductions; reduce
        # (chunk, 128) -> (8, 128) with pure VPU vreg-wise adds (no XLU).
        groups = x.shape[0] // 8
        inter_ref[0] += (x * y).reshape(groups, 8, _LANES).sum(axis=0)
        total_ref[0] += (x + y).reshape(groups, 8, _LANES).sum(axis=0)

    if n_chunks == 1:
        reduce_into(x_ref[...].astype(jnp.float32), y_ref[...].astype(jnp.float32))
    else:
        def body(g, carry):
            start = pl.multiple_of(g * chunk, chunk)
            reduce_into(x_ref[pl.ds(start, chunk), :].astype(jnp.float32),
                        y_ref[pl.ds(start, chunk), :].astype(jnp.float32))
            return carry
        lax.fori_loop(0, n_chunks, body, 0)


def iou_loss(inputs, targets, smooth=1.0):
    """Pallas TPU equivalent of IoULoss().forward(inputs, targets, smooth)."""
    assert inputs.shape == targets.shape, (inputs.shape, targets.shape)
    n = int(inputs.size)

    x = inputs.reshape(-1)
    y = targets.reshape(-1)

    itemsize = jnp.dtype(inputs.dtype).itemsize
    # dtype-specific sublane tile: 8 for f32, 16 for bf16, 32 for int8/fp8.
    sub = max(8, 32 // max(1, itemsize))

    gen = _tpu_generation()
    max_rows = _round_down(_block_budget_bytes(gen) // (_LANES * itemsize), _CHUNK_ROWS)
    max_rows = max(max_rows, _CHUNK_ROWS)

    lane_rows = n // _LANES                 # complete 128-wide rows
    if lane_rows >= _CHUNK_ROWS:
        block_rows = min(max_rows, _round_down(lane_rows, _CHUNK_ROWS))
    elif lane_rows >= sub:
        block_rows = _round_down(lane_rows, sub)
    else:
        block_rows = 0

    n_blocks = lane_rows // block_rows if block_rows else 0

    # 2-way split only where it is real parallelism (v7x has 2 TensorCores);
    # on 1-TC chips it would only add padding / writeback / re-init overhead.
    if gen == 7 and n_blocks >= 2:
        n_splits = 2
        n_blocks = _round_down(n_blocks, 2)
        split_sem = _CORE_PARALLEL
    else:
        n_splits = 1
        split_sem = pltpu.ARBITRARY
    blocks_per_split = n_blocks // n_splits if n_blocks else 0

    rows_used = n_blocks * block_rows
    elems_used = rows_used * _LANES

    # Ragged remainder (< one block of rows + < 128 trailing elements):
    # reduced with plain XLA instead of padding/streaming zero blocks.
    tail_inter = jnp.zeros((), jnp.float32)
    tail_total = jnp.zeros((), jnp.float32)
    if elems_used < n:
        tx = x[elems_used:].astype(jnp.float32)
        ty = y[elems_used:].astype(jnp.float32)
        tail_inter = jnp.sum(tx * ty)
        tail_total = jnp.sum(tx + ty)

    if n_blocks == 0:
        # Input too small to form even one (sub, 128) block; XLA handles it all.
        intersection = tail_inter
        total = tail_total
    else:
        # Bitcast reshape when the whole input is block-aligned (the common
        # case); only a ragged prefix slice otherwise -- never a full jnp.pad.
        x2 = (x if elems_used == n else x[:elems_used]).reshape(rows_used, _LANES)
        y2 = (y if elems_used == n else y[:elems_used]).reshape(rows_used, _LANES)

        cost = pl.CostEstimate(
            flops=5 * elems_used,
            transcendentals=0,
            bytes_accessed=2 * elems_used * itemsize + 2 * n_splits * 8 * _LANES * 4,
        )

        part_shape = jax.ShapeDtypeStruct((n_splits, 8, _LANES), jnp.float32)
        part_spec = pl.BlockSpec((1, 8, _LANES), lambda s, j: (s, 0, 0))
        in_spec = pl.BlockSpec((block_rows, _LANES),
                               lambda s, j: (s * blocks_per_split + j, 0))

        inter_part, total_part = pl.pallas_call(
            _iou_partial_kernel,
            out_shape=(part_shape, part_shape),
            grid_spec=pltpu.PrefetchScalarGridSpec(
                num_scalar_prefetch=0,
                grid=(n_splits, blocks_per_split),
                in_specs=[in_spec, in_spec],
                out_specs=(part_spec, part_spec),
            ),
            compiler_params=pltpu.CompilerParams(
                dimension_semantics=(split_sem, pltpu.ARBITRARY)),
            cost_estimate=cost,
        )(x2, y2)

        intersection = jnp.sum(inter_part) + tail_inter
        total = jnp.sum(total_part) + tail_total

    union = total - intersection
    s = jnp.float32(smooth)
    return -(intersection + s) / (union + s)


def _reference_iou_loss(inputs, targets, smooth=1.0):
    xf = inputs.reshape(-1).astype(jnp.float32)
    yf = targets.reshape(-1).astype(jnp.float32)
    intersection = jnp.sum(xf * yf)
    total = jnp.sum(xf + yf)
    union = total - intersection
    return -(intersection + smooth) / (union + smooth)


if __name__ == "__main__":
    key = jax.random.PRNGKey(0)
    k1, k2 = jax.random.split(key)
    # inputs: probabilities in (0,1); targets: binary mask. NCHW layout.
    inputs = jax.random.uniform(k1, (2, 4, 16, 16), dtype=jnp.float32)
    targets = (jax.random.uniform(k2, (2, 4, 16, 16)) > 0.5).astype(jnp.float32)

    loss = iou_loss(inputs, targets, smooth=1.0)
    loss = jax.block_until_ready(loss)

    ref = _reference_iou_loss(inputs, targets, smooth=1.0)
    assert jnp.allclose(loss, ref, rtol=1e-5, atol=1e-5), (loss, ref)
    print("KERNEL_OK")
</pallas_src>

<mosaic_0001>
module attributes {stable_mosaic.version = 11 : i64} {
  func.func @_iou_partial_kernel(%arg0: i32, %arg1: i32, %arg2: memref<16x128xf32, #tpu.memory_space<vmem>>, %arg3: memref<16x128xf32, #tpu.memory_space<vmem>>, %arg4: memref<1x8x128xf32, #tpu.memory_space<vmem>>, %arg5: memref<1x8x128xf32, #tpu.memory_space<vmem>>) attributes {dimension_semantics = [#tpu.dimension_semantics<arbitrary>, #tpu.dimension_semantics<arbitrary>], iteration_bounds = array<i64: 1, 1>, scalar_prefetch = 0 : i64, scratch_operands = 0 : i64, tpu.core_type = #tpu.core_type<tc>, window_params = [{transform_indices = @transform_0, window_bounds = array<i64: 16, 128>}, {transform_indices = @transform_1, window_bounds = array<i64: 16, 128>}, {transform_indices = @transform_2, window_bounds = array<i64: 1, 8, 128>}, {transform_indices = @transform_3, window_bounds = array<i64: 1, 8, 128>}]} {
    %c0_i32 = arith.constant 0 : i32
    %0 = arith.cmpi eq, %arg1, %c0_i32 : i32
    %1 = arith.extui %0 : i1 to i32
    %c0_i32_0 = arith.constant 0 : i32
    %2 = arith.cmpi ne, %1, %c0_i32_0 : i32
    scf.if %2 {
      %cst_17 = arith.constant 0.000000e+00 : f32
      %23 = vector.broadcast %cst_17 : f32 to vector<1x8x128xf32>
      %c0_18 = arith.constant 0 : index
      %c0_19 = arith.constant 0 : index
      %c0_20 = arith.constant 0 : index
      %24 = vector.load %arg4[%c0_18, %c0_19, %c0_20] : memref<1x8x128xf32, #tpu.memory_space<vmem>>, vector<1x8x128xf32>
      tpu.vector_store %arg4[%c0_18, %c0_19, %c0_20], %23 {strides = array<i32>} : memref<1x8x128xf32, #tpu.memory_space<vmem>>, vector<1x8x128xf32>,
      %cst_21 = arith.constant 0.000000e+00 : f32
      %25 = vector.broadcast %cst_21 : f32 to vector<1x8x128xf32>
      %c0_22 = arith.constant 0 : index
      %c0_23 = arith.constant 0 : index
      %c0_24 = arith.constant 0 : index
      %26 = vector.load %arg5[%c0_22, %c0_23, %c0_24] : memref<1x8x128xf32, #tpu.memory_space<vmem>>, vector<1x8x128xf32>
      tpu.vector_store %arg5[%c0_22, %c0_23, %c0_24], %25 {strides = array<i32>} : memref<1x8x128xf32, #tpu.memory_space<vmem>>, vector<1x8x128xf32>,
    } else {
    }
    %c0 = arith.constant 0 : index
    %c0_1 = arith.constant 0 : index
    %3 = vector.load %arg2[%c0, %c0_1] : memref<16x128xf32, #tpu.memory_space<vmem>>, vector<16x128xf32>
    %c0_2 = arith.constant 0 : index
    %c0_3 = arith.constant 0 : index
    %4 = vector.load %arg3[%c0_2, %c0_3] : memref<16x128xf32, #tpu.memory_space<vmem>>, vector<16x128xf32>
    %c0_4 = arith.constant 0 : index
    %c0_5 = arith.constant 0 : index
    %c0_6 = arith.constant 0 : index
    %5 = vector.load %arg4[%c0_4, %c0_5, %c0_6] : memref<1x8x128xf32, #tpu.memory_space<vmem>>, vector<1x8x128xf32>
    %6 = vector.shape_cast %5 : vector<1x8x128xf32> to vector<8x128xf32>
    %7 = arith.mulf %3, %4 : vector<16x128xf32>
    %8 = vector.shape_cast %7 : vector<16x128xf32> to vector<2x8x128xf32>
    %cst = arith.constant dense<0.000000e+00> : vector<8x128xf32>
    %9 = vector.multi_reduction <add>, %8, %cst [0] : vector<2x8x128xf32> to vector<8x128xf32>
    %10 = arith.addf %6, %9 : vector<8x128xf32>
    %c0_7 = arith.constant 0 : index
    %c0_8 = arith.constant 0 : index
    %c0_9 = arith.constant 0 : index
    %11 = vector.load %arg4[%c0_7, %c0_8, %c0_9] : memref<1x8x128xf32, #tpu.memory_space<vmem>>, vector<1x8x128xf32>
    %12 = vector.shape_cast %11 : vector<1x8x128xf32> to vector<8x128xf32>
    %13 = vector.shape_cast %10 : vector<8x128xf32> to vector<1x8x128xf32>
    tpu.vector_store %arg4[%c0_7, %c0_8, %c0_9], %13 {strides = array<i32>} : memref<1x8x128xf32, #tpu.memory_space<vmem>>, vector<1x8x128xf32>,
    %c0_10 = arith.constant 0 : index
    %c0_11 = arith.constant 0 : index
    %c0_12 = arith.constant 0 : index
    %14 = vector.load %arg5[%c0_10, %c0_11, %c0_12] : memref<1x8x128xf32, #tpu.memory_space<vmem>>, vector<1x8x128xf32>
    %15 = vector.shape_cast %14 : vector<1x8x128xf32> to vector<8x128xf32>
    %16 = arith.addf %3, %4 : vector<16x128xf32>
    %17 = vector.shape_cast %16 : vector<16x128xf32> to vector<2x8x128xf32>
    %cst_13 = arith.constant dense<0.000000e+00> : vector<8x128xf32>
    %18 = vector.multi_reduction <add>, %17, %cst_13 [0] : vector<2x8x128xf32> to vector<8x128xf32>
    %19 = arith.addf %15, %18 : vector<8x128xf32>
    %c0_14 = arith.constant 0 : index
    %c0_15 = arith.constant 0 : index
    %c0_16 = arith.constant 0 : index
    %20 = vector.load %arg5[%c0_14, %c0_15, %c0_16] : memref<1x8x128xf32, #tpu.memory_space<vmem>>, vector<1x8x128xf32>
    %21 = vector.shape_cast %20 : vector<1x8x128xf32> to vector<8x128xf32>
    %22 = vector.shape_cast %19 : vector<8x128xf32> to vector<1x8x128xf32>
    tpu.vector_store %arg5[%c0_14, %c0_15, %c0_16], %22 {strides = array<i32>} : memref<1x8x128xf32, #tpu.memory_space<vmem>>, vector<1x8x128xf32>,
    return
  }
  func.func @transform_0(%arg0: i32, %arg1: i32) -> (i32, i32) {
    %c1_i32 = arith.constant 1 : i32
    %0 = arith.muli %arg0, %c1_i32 : i32
    %1 = arith.addi %0, %arg1 : i32
    %c0_i32 = arith.constant 0 : i32
    %c0_i32_0 = arith.constant 0 : i32
    return %1, %c0_i32 : i32, i32
  }
  func.func @transform_1(%arg0: i32, %arg1: i32) -> (i32, i32) {
    %c1_i32 = arith.constant 1 : i32
    %0 = arith.muli %arg0, %c1_i32 : i32
    %1 = arith.addi %0, %arg1 : i32
    %c0_i32 = arith.constant 0 : i32
    %c0_i32_0 = arith.constant 0 : i32
    return %1, %c0_i32 : i32, i32
  }
  func.func @transform_2(%arg0: i32, %arg1: i32) -> (i32, i32, i32) {
    %c0_i32 = arith.constant 0 : i32
    %c0_i32_0 = arith.constant 0 : i32
    %c0_i32_1 = arith.constant 0 : i32
    return %arg0, %c0_i32, %c0_i32_0 : i32, i32, i32
  }
  func.func @transform_3(%arg0: i32, %arg1: i32) -> (i32, i32, i32) {
    %c0_i32 = arith.constant 0 : i32
    %c0_i32_0 = arith.constant 0 : i32
    %c0_i32_1 = arith.constant 0 : i32
    return %arg0, %c0_i32, %c0_i32_0 : i32, i32, i32
  }
}

</mosaic_0001>

<bundles_post_ra>
// kernel: tpu_custom_call.1
= control target key start
LH: loop header
LB: loop body
LE: loop exit
PB: predicated region body
PF: predicated region fallthrough
CT: control target
= control target key end

     0   :  { %9 = vsyncpa [#allocation3], 0  ;;  %s240_s0 = inlined_call_operand.hbm [shape: f32[16,128], index: 0, kind: input, shape index: {}]   ;;  %s241_s1 = inlined_call_operand.hbm [shape: f32[16,128], index: 1, kind: input, shape index: {}]   ;;  %s242_s2 = inlined_call_operand.hbm [shape: f32[1,8,128], index: 2, kind: output, shape index: {0}]   ;;  %s243_s3 = inlined_call_operand.hbm [shape: f32[1,8,128], index: 3, kind: output, shape index: {1}]  }
   0x1   :  { %10 = vsyncpa [#allocation6], 0 }
   0x2   :  { %11 = vsyncpa [#allocation4], 0 }
   0x3   :  { %12 = vsyncpa [#allocation9], 0  ;;  %s202_s12 = smov [#allocation2]  }
   0x4   :  { %s22_s13 = sshll.u32 %s202_s12, 4  ;;  %s23_s13 = int_to_ptr.vmem [resolvable:$true] %s22_s13 }
   0x5   :  { %s122_s14 = scalar_lea.vmem %s23_s13, 256  ;;  %p127_p1 = scmp.lt.s32.totalorder %s23_s13, %s23_s13 }
   0x6   :  { %p123_p0 = scmp.ne.s32.totalorder %s23_s13, %s122_s14  ;;  %p128_p2 = scmp.lt.s32.totalorder %s122_s14, %s122_s14 }
   0x8   :  { %p129_p3 = por %p128_p2, %p127_p1 }
   0xa   :  { %p130_p4 = pnand %p129_p3, %p123_p0 }
   0xc   :  { %133 = shalt.err (!%p130_p4)
}
   0xd   :  { %s203_s15 = smov 128   ;;  %s204_s16 = smov 8  }
   0xe   :  { %28 = dma.hbm_to_vmem [thread:$0]  %s240_s0, 256, %s23_s13, [#allocation3], %s203_s15, %s203_s15, %s204_s16  }
   0xf   :  { %s205_s19 = smov [#allocation5]  }
  0x10   :  { %s38_s20 = sshll.u32 %s205_s19, 4  ;;  %s39_s20 = int_to_ptr.vmem [resolvable:$true] %s38_s20 }
  0x11   :  { %s142_s21 = scalar_lea.vmem %s39_s20, 256  ;;  %p147_p6 = scmp.lt.s32.totalorder %s39_s20, %s39_s20 }
  0x12   :  { %p143_p5 = scmp.ne.s32.totalorder %s39_s20, %s142_s21  ;;  %p148_p7 = scmp.lt.s32.totalorder %s142_s21, %s142_s21 }
  0x14   :  { %p149_p8 = por %p148_p7, %p147_p6 }
  0x16   :  { %p150_p9 = pnand %p149_p8, %p143_p5 }
  0x18   :  { %153 = shalt.err (!%p150_p9)
}
  0x19   :  { %44 = dma.hbm_to_vmem [thread:$0]  %s241_s1, 256, %s39_s20, [#allocation6], %s203_s15, %s203_s15, %s204_s16  }
  0x1a   :  { %194 = dma.done.wait [#allocation3], 256  }
  0x1b   :  { %195 = vsyncadd [#allocation3], 4294967040 }
  0x1c   :  { %196 = dma.done.wait [#allocation6], 256  }
  0x1d   :  { %197 = vsyncadd [#allocation6], 4294967040  ;;  %v61_v0 = vld [vmem:[#allocation2] sm:$0xff]  ;;  %v62_v1 = vld [vmem:[#allocation2 + $0x8] sm:$0xff]  ;;  %s206_s0 = smov [#allocation7]   ;;  %s207_s25 = smov [#allocation8]  }
  0x1e   :  { %v63_v2 = vld [vmem:[#allocation5] sm:$0xff]  ;;  %v64_v3 = vld [vmem:[#allocation5 + $0x8] sm:$0xff]  ;;  %s83_s24 = sshll.u32 %s206_s0, 4  ;;  %s93_s26 = sshll.u32 %s207_s25, 4  ;;  %s84_s24 = int_to_ptr.vmem [resolvable:$true] %s83_s24  ;;  %s94_s26 = int_to_ptr.vmem [resolvable:$true] %s93_s26 }
  0x1f   :  { %v66_v4 = vmul.f32 %v63_v2, %v61_v0  ;;  %v72_v5 = vadd.f32 %v63_v2, %v61_v0  ;;  %v67_v6 = vmul.f32 %v64_v3, %v62_v1  ;;  %v73_v7 = vadd.f32 %v64_v3, %v62_v1  ;;  %s154_s1 = scalar_lea.vmem %s84_s24, 128  ;;  %p159_p11 = scmp.lt.s32.totalorder %s84_s24, %s84_s24 }
  0x20   :  { %p155_p10 = scmp.ne.s32.totalorder %s84_s24, %s154_s1  ;;  %p160_p12 = scmp.lt.s32.totalorder %s154_s1, %s154_s1 }
  0x21   :  { %v68_v8 = vadd.f32 %v67_v6, %v66_v4  ;;  %v74_v9 = vadd.f32 %v73_v7, %v72_v5 }
  0x22   :  { %p161_p13 = por %p160_p12, %p159_p11 }
  0x23   :  { %70 = vst [vmem:[#allocation7] sm:$0xff] %v68_v8  ;;  %76 = vst [vmem:[#allocation8] sm:$0xff] %v74_v9 }
  0x24   :  { %p162_p0 = pnand %p161_p13, %p155_p10 }
  0x26   :  { %165 = shalt.err (!%p162_p0)
}
  0x27   :  { %86 = dma.vmem_to_hbm [thread:$0]  %s84_s24, 128, %s242_s2, [#allocation4]  }
  0x28   :  { %s174_s29 = scalar_lea.vmem %s94_s26, 128  ;;  %p179_p2 = scmp.lt.s32.totalorder %s94_s26, %s94_s26 }
  0x29   :  { %p175_p1 = scmp.ne.s32.totalorder %s94_s26, %s174_s29  ;;  %p180_p3 = scmp.lt.s32.totalorder %s174_s29, %s174_s29 }
  0x2b   :  { %p181_p4 = por %p180_p3, %p179_p2 }
  0x2d   :  { %p182_p5 = pnand %p181_p4, %p175_p1 }
  0x2f   :  { %185 = shalt.err (!%p182_p5)
}
  0x30   :  { %96 = dma.vmem_to_hbm [thread:$0]  %s94_s26, 128, %s243_s3, [#allocation9]  }
  0x31   :  { %198 = dma.done.wait [#allocation4], 128  }
  0x32   :  { %199 = vsyncadd [#allocation4], 4294967168 }
  0x33   :  { %200 = dma.done.wait [#allocation9], 128  }
  0x34   :  { %201 = vsyncadd [#allocation9], 4294967168 }
  0x35   :  { %103 = vsyncpa [#allocation3], 1 }
  0x36   :  { %104 = vsyncpa [#allocation6], 1 }
  0x37   :  { %105 = vsyncpa [#allocation4], 1 }
  0x38   :  { %106 = vsyncpa [#allocation9], 1 }

</bundles_post_ra>
